<compile_context>
chip_gen: v6e
topology: v6e:2x2x1
jax: 0.10.0
libtpu: 0.0.40
codegen_flags: <defaults>
</compile_context>

<pallas_src>
import math

import jax
import jax.numpy as jnp
from jax.experimental import pallas as pl
from jax.experimental.pallas import tpu as pltpu


# --------------------------------------------------------------------------- helpers

def _softplus(x):
    # Numerically stable softplus: max(x,0) + log1p(exp(-|x|)).
    return jnp.maximum(x, 0.0) + jnp.log1p(jnp.exp(-jnp.abs(x)))


def _round_up(x, m):
    return (x + m - 1) // m * m


# ---------------------------------------------------------------------------- kernel

def _gl_kernel(x_ref, wmu_ref, wsig_ref, weps_ref, b_ref, o_ref, acc_ref):
    """One (tb, to) output tile; K (reduction) is the innermost grid axis.

    All streamed tiles are bf16 (half the HBM bytes of f32); the cheap sampling
    math runs in f32 on the VPU and the matmul accumulates in f32 in VMEM.
    """
    k = pl.program_id(2)

    @pl.when(k == 0)
    def _init():
        acc_ref[...] = jnp.zeros_like(acc_ref)

    # Reparameterized weight sample for this [to, tk] tile (sigma precomputed
    # in the wrapper, so no softplus / EUP work here).
    w = (wmu_ref[...].astype(jnp.float32)
         + wsig_ref[...].astype(jnp.float32) * weps_ref[...].astype(jnp.float32))

    # MXU: contract the last dims of x[tb,tk] and w[to,tk] -> [tb,to]; no
    # materialized transpose, bf16 inputs, f32 accumulation.
    acc_ref[...] += jax.lax.dot_general(
        x_ref[...], w.astype(jnp.bfloat16),
        dimension_numbers=(((1,), (1,)), ((), ())),
        preferred_element_type=jnp.float32)

    @pl.when(k == pl.num_programs(2) - 1)
    def _finalize():
        # Bias was sampled in f32 in the wrapper; add once, on the last K step.
        o_ref[...] = (acc_ref[...] + b_ref[...]).astype(o_ref.dtype)


# --------------------------------------------------------------------------- wrapper

def gaussian_linear(x, w_mu, w_rho, b_mu, b_rho, *, eps_w=None, eps_b=None,
                    key=None, tb=512, to=512, tk=1024):
    """y = x @ (W_mu + softplus(W_rho)*eps_W).T + (b_mu + softplus(b_rho)*eps_b).

    Pass eps_w / eps_b explicitly (bit-checkable against a reference) or a
    `key`, in which case one N(0,1) sample per forward is drawn in the wrapper.
    """
    B, K = x.shape
    O, K2 = w_mu.shape
    assert K == K2 and b_mu.shape == (O,) and b_rho.shape == (O,)

    if eps_w is None or eps_b is None:
        assert key is not None, "provide eps_w/eps_b or a PRNG key"
        kw, kb = jax.random.split(key)
        if eps_w is None:
            eps_w = jax.random.normal(kw, (O, K), jnp.float32)
        if eps_b is None:
            eps_b = jax.random.normal(kb, (O,), jnp.float32)
    assert eps_w.shape == (O, K) and eps_b.shape == (O,)

    # Tiles: sublane dim a multiple of 8, lane dims multiples of 128, clamped
    # to the padded problem so small layers collapse to a single tile.
    tb = min(tb, _round_up(B, 8))
    to = min(to, _round_up(O, 128))
    tk = min(tk, _round_up(K, 128))
    Bp, Op, Kp = _round_up(B, tb), _round_up(O, to), _round_up(K, tk)

    bf16, f32 = jnp.bfloat16, jnp.float32

    def stream_bf16(a, r, c):
        # The bf16 copy has to exist anyway (it is what the kernel streams);
        # pad it only if the shape is ragged, and pad the bf16 copy, not f32.
        a = a.astype(bf16)
        if a.shape != (r, c):
            a = jnp.pad(a, ((0, r - a.shape[0]), (0, c - a.shape[1])))
        return a

    xp = stream_bf16(x, Bp, Kp)
    wmu_p = stream_bf16(w_mu, Op, Kp)
    wsig_p = stream_bf16(_softplus(w_rho.astype(f32)), Op, Kp)   # one fused XLA pass
    weps_p = stream_bf16(eps_w, Op, Kp)

    # Bias is tiny: sample it fully in f32 here, stream as a (1, Op) row.
    b = b_mu.astype(f32) + _softplus(b_rho.astype(f32)) * eps_b.astype(f32)
    if O != Op:
        b = jnp.pad(b, (0, Op - O))
    b = b.reshape(1, Op)

    grid = (Bp // tb, Op // to, Kp // tk)                 # K (reduction) innermost

    x_spec = pl.BlockSpec((tb, tk), lambda i, j, k: (i, k))
    w_spec = pl.BlockSpec((to, tk), lambda i, j, k: (j, k))
    b_spec = pl.BlockSpec((1, to), lambda i, j, k: (0, j))
    o_spec = pl.BlockSpec((tb, to), lambda i, j, k: (i, j))

    # VMEM at max tiles (512, 512, 1024) bf16:
    #   2 * (x 1 MiB + 3 weight streams 3 MiB) + acc 1 MiB + out ~2 MiB ~= 12 MiB
    # -> fits the scoped limit on v5e/v6e/v7x (v7x: 64 MiB physical).
    cparams = pltpu.CompilerParams(
        dimension_semantics=("parallel", "parallel", "arbitrary"),
        vmem_limit_bytes=48 * 1024 * 1024)

    yp = pl.pallas_call(
        _gl_kernel,
        out_shape=jax.ShapeDtypeStruct((Bp, Op), x.dtype),
        grid_spec=pltpu.PrefetchScalarGridSpec(
            num_scalar_prefetch=0, grid=grid,
            in_specs=[x_spec, w_spec, w_spec, w_spec, b_spec],
            out_specs=o_spec,
            scratch_shapes=[pltpu.VMEM((tb, to), jnp.float32)]),
        compiler_params=cparams,
    )(xp, wmu_p, wsig_p, weps_p, b)

    if (Bp, Op) != (B, O):
        yp = yp[:B, :O]
    return yp


def init_gaussian_linear_params(key, size_in, size_out):
    """Deterministic re-implementation of GaussianLinear.reset_parameters()."""
    k_wmu, k_bmu = jax.random.split(key)
    # kaiming_uniform_(a=sqrt(5)) on [size_out, size_in] -> bound = 1/sqrt(fan_in)
    bound = 1.0 / math.sqrt(size_in)
    w_mu = jax.random.uniform(k_wmu, (size_out, size_in), jnp.float32, -bound, bound)
    w_rho = jnp.full((size_out, size_in), -4.0, jnp.float32)
    b_mu = jax.random.uniform(k_bmu, (size_out,), jnp.float32, -bound, bound)
    b_rho = jnp.full((size_out,), -4.0, jnp.float32)
    return w_mu, w_rho, b_mu, b_rho


# ----------------------------------------------------------------------------- main

if __name__ == "__main__":
    root = jax.random.PRNGKey(0)

    def run_check(batch, size_in, size_out, key):
        k_p, k_x, k_ew, k_eb = jax.random.split(key, 4)
        w_mu, w_rho, b_mu, b_rho = init_gaussian_linear_params(k_p, size_in, size_out)
        x = jax.random.normal(k_x, (batch, size_in), jnp.float32)
        eps_w = jax.random.normal(k_ew, (size_out, size_in), jnp.float32)
        eps_b = jax.random.normal(k_eb, (size_out,), jnp.float32)

        y = gaussian_linear(x, w_mu, w_rho, b_mu, b_rho, eps_w=eps_w, eps_b=eps_b)
        jax.block_until_ready(y)
        assert y.shape == (batch, size_out)

        # Reference emulating the kernel's bf16 HBM streams (f32 accumulation).
        q = lambda a: a.astype(jnp.bfloat16).astype(jnp.float32)
        w = (q(w_mu) + q(_softplus(w_rho)) * q(eps_w)).astype(jnp.bfloat16).astype(jnp.float32)
        b = b_mu + _softplus(b_rho) * eps_b
        y_ref = q(x) @ w.T + b
        err = float(jnp.max(jnp.abs(y - y_ref)))
        assert jnp.allclose(y, y_ref, atol=2e-2, rtol=2e-2), f"max abs err {err}"
        return x, w_mu, w_rho, b_mu, b_rho

    # 1) Small ragged shapes (exercise the bf16 padding path; single tile).
    run_check(8, 32, 16, jax.random.fold_in(root, 1))

    # 2) Lane/MXU-aligned shapes: multi-tile out axis and K reduction.
    x, w_mu, w_rho, b_mu, b_rho = run_check(128, 2048, 640, jax.random.fold_in(root, 2))

    # 3) Wrapper-sampled noise path: one N(0,1) draw per forward, seed-deterministic.
    # TODO(synk): on-chip hardware-PRNG sampling (pltpu.prng_seed/prng_random_bits)
    # is omitted -- it does not lower under CPU interpret and was the flagged
    # VALU/EUP hotspot; noise is sampled once per forward in the wrapper instead.
    y1 = gaussian_linear(x, w_mu, w_rho, b_mu, b_rho, key=jax.random.PRNGKey(7))
    y2 = gaussian_linear(x, w_mu, w_rho, b_mu, b_rho, key=jax.random.PRNGKey(7))
    jax.block_until_ready((y1, y2))
    assert bool(jnp.array_equal(y1, y2)), "key-driven sampling is not deterministic"
    assert bool(jnp.all(jnp.isfinite(y1)))

    print("KERNEL_OK")
</pallas_src>

<mosaic_0001>
module attributes {stable_mosaic.version = 11 : i64} {
  func.func @_gl_kernel(%arg0: i32, %arg1: i32, %arg2: i32, %arg3: memref<8x128xbf16, #tpu.memory_space<vmem>>, %arg4: memref<128x128xbf16, #tpu.memory_space<vmem>>, %arg5: memref<128x128xbf16, #tpu.memory_space<vmem>>, %arg6: memref<128x128xbf16, #tpu.memory_space<vmem>>, %arg7: memref<1x128xf32, #tpu.memory_space<vmem>>, %arg8: memref<8x128xf32, #tpu.memory_space<vmem>>, %arg9: memref<8x128xf32, #tpu.memory_space<vmem>>) attributes {dimension_semantics = [#tpu.dimension_semantics<parallel>, #tpu.dimension_semantics<parallel>, #tpu.dimension_semantics<arbitrary>], iteration_bounds = array<i64: 1, 1, 1>, scalar_prefetch = 0 : i64, scratch_operands = 1 : i64, tpu.core_type = #tpu.core_type<tc>, window_params = [{transform_indices = @transform_0, window_bounds = array<i64: 8, 128>}, {transform_indices = @transform_1, window_bounds = array<i64: 128, 128>}, {transform_indices = @transform_2, window_bounds = array<i64: 128, 128>}, {transform_indices = @transform_3, window_bounds = array<i64: 128, 128>}, {transform_indices = @transform_4, window_bounds = array<i64: 1, 128>}, {transform_indices = @transform_5, window_bounds = array<i64: 8, 128>}]} {
    %c0_i32 = arith.constant 0 : i32
    %0 = arith.cmpi eq, %arg2, %c0_i32 : i32
    %1 = arith.extui %0 : i1 to i32
    %c0_i32_0 = arith.constant 0 : i32
    %2 = arith.cmpi ne, %1, %c0_i32_0 : i32
    scf.if %2 {
      %cst_14 = arith.constant 0.000000e+00 : f32
      %20 = vector.broadcast %cst_14 : f32 to vector<8x128xf32>
      %c0_15 = arith.constant 0 : index
      %c0_16 = arith.constant 0 : index
      %21 = vector.load %arg9[%c0_15, %c0_16] : memref<8x128xf32, #tpu.memory_space<vmem>>, vector<8x128xf32>
      tpu.vector_store %arg9[%c0_15, %c0_16], %20 {strides = array<i32>} : memref<8x128xf32, #tpu.memory_space<vmem>>, vector<8x128xf32>,
    } else {
    }
    %c0 = arith.constant 0 : index
    %c0_1 = arith.constant 0 : index
    %3 = vector.load %arg4[%c0, %c0_1] : memref<128x128xbf16, #tpu.memory_space<vmem>>, vector<128x128xbf16>
    %4 = arith.extf %3 : vector<128x128xbf16> to vector<128x128xf32>
    %c0_2 = arith.constant 0 : index
    %c0_3 = arith.constant 0 : index
    %5 = vector.load %arg5[%c0_2, %c0_3] : memref<128x128xbf16, #tpu.memory_space<vmem>>, vector<128x128xbf16>
    %6 = arith.extf %5 : vector<128x128xbf16> to vector<128x128xf32>
    %c0_4 = arith.constant 0 : index
    %c0_5 = arith.constant 0 : index
    %7 = vector.load %arg6[%c0_4, %c0_5] : memref<128x128xbf16, #tpu.memory_space<vmem>>, vector<128x128xbf16>
    %8 = arith.extf %7 : vector<128x128xbf16> to vector<128x128xf32>
    %9 = arith.mulf %6, %8 : vector<128x128xf32>
    %10 = arith.addf %4, %9 : vector<128x128xf32>
    %c0_6 = arith.constant 0 : index
    %c0_7 = arith.constant 0 : index
    %11 = vector.load %arg9[%c0_6, %c0_7] : memref<8x128xf32, #tpu.memory_space<vmem>>, vector<8x128xf32>
    %c0_8 = arith.constant 0 : index
    %c0_9 = arith.constant 0 : index
    %12 = vector.load %arg3[%c0_8, %c0_9] : memref<8x128xbf16, #tpu.memory_space<vmem>>, vector<8x128xbf16>
    %13 = arith.truncf %10 : vector<128x128xf32> to vector<128x128xbf16>
    %cst = arith.constant dense<0.000000e+00> : vector<8x128xf32>
    %14 = tpu.matmul %12, %13, %cst {dimension_numbers = #tpu.dot_dimension_numbers<[1], [1], [0], [0], [0, 0, 1, 0], [], []>} : vector<8x128xbf16>, vector<128x128xbf16>, vector<8x128xf32> -> vector<8x128xf32>
    %15 = arith.addf %11, %14 : vector<8x128xf32>
    %c0_10 = arith.constant 0 : index
    %c0_11 = arith.constant 0 : index
    %16 = vector.load %arg9[%c0_10, %c0_11] : memref<8x128xf32, #tpu.memory_space<vmem>>, vector<8x128xf32>
    tpu.vector_store %arg9[%c0_10, %c0_11], %15 {strides = array<i32>} : memref<8x128xf32, #tpu.memory_space<vmem>>, vector<8x128xf32>,
    %c0_i32_12 = arith.constant 0 : i32
    %17 = arith.cmpi eq, %arg2, %c0_i32_12 : i32
    %18 = arith.extui %17 : i1 to i32
    %c0_i32_13 = arith.constant 0 : i32
    %19 = arith.cmpi ne, %18, %c0_i32_13 : i32
    scf.if %19 {
      %c0_14 = arith.constant 0 : index
      %c0_15 = arith.constant 0 : index
      %20 = vector.load %arg9[%c0_14, %c0_15] : memref<8x128xf32, #tpu.memory_space<vmem>>, vector<8x128xf32>
      %c0_16 = arith.constant 0 : index
      %c0_17 = arith.constant 0 : index
      %21 = vector.load %arg7[%c0_16, %c0_17] : memref<1x128xf32, #tpu.memory_space<vmem>>, vector<1x128xf32>
      %22 = vector.broadcast %21 : vector<1x128xf32> to vector<8x128xf32>
      %23 = arith.addf %20, %22 : vector<8x128xf32>
      %c0_18 = arith.constant 0 : index
      %c0_19 = arith.constant 0 : index
      %24 = vector.load %arg8[%c0_18, %c0_19] : memref<8x128xf32, #tpu.memory_space<vmem>>, vector<8x128xf32>
      tpu.vector_store %arg8[%c0_18, %c0_19], %23 {strides = array<i32>} : memref<8x128xf32, #tpu.memory_space<vmem>>, vector<8x128xf32>,
    } else {
    }
    return
  }
  func.func @transform_0(%arg0: i32, %arg1: i32, %arg2: i32) -> (i32, i32) {
    %c0_i32 = arith.constant 0 : i32
    return %arg0, %arg2 : i32, i32
  }
  func.func @transform_1(%arg0: i32, %arg1: i32, %arg2: i32) -> (i32, i32) {
    %c0_i32 = arith.constant 0 : i32
    return %arg1, %arg2 : i32, i32
  }
  func.func @transform_2(%arg0: i32, %arg1: i32, %arg2: i32) -> (i32, i32) {
    %c0_i32 = arith.constant 0 : i32
    return %arg1, %arg2 : i32, i32
  }
  func.func @transform_3(%arg0: i32, %arg1: i32, %arg2: i32) -> (i32, i32) {
    %c0_i32 = arith.constant 0 : i32
    return %arg1, %arg2 : i32, i32
  }
  func.func @transform_4(%arg0: i32, %arg1: i32, %arg2: i32) -> (i32, i32) {
    %c0_i32 = arith.constant 0 : i32
    %c0_i32_0 = arith.constant 0 : i32
    return %c0_i32, %arg1 : i32, i32
  }
  func.func @transform_5(%arg0: i32, %arg1: i32, %arg2: i32) -> (i32, i32) {
    %c0_i32 = arith.constant 0 : i32
    return %arg0, %arg1 : i32, i32
  }
}

</mosaic_0001>

<bundles_post_ra>
// kernel: tpu_custom_call.1
= control target key start
LH: loop header
LB: loop body
LE: loop exit
PB: predicated region body
PF: predicated region fallthrough
CT: control target
= control target key end

     0   :  { %10 = vsyncpa [#allocation4], 0  ;;  %s629_s0 = inlined_call_operand.hbm [shape: bf16[8,128], index: 0, kind: input, shape index: {}]   ;;  %s630_s1 = inlined_call_operand.hbm [shape: bf16[128,128], index: 1, kind: input, shape index: {}]   ;;  %s631_s2 = inlined_call_operand.hbm [shape: bf16[128,128], index: 2, kind: input, shape index: {}]   ;;  %s632_s3 = inlined_call_operand.hbm [shape: bf16[128,128], index: 3, kind: input, shape index: {}]   ;;  %s633_s4 = inlined_call_operand.vmem [shape: f32[1,128], index: 4, kind: input, shape index: {}]   ;;  %s634_s5 = inlined_call_operand.hbm [shape: f32[8,128], index: 5, kind: output, shape index: {}]  }
   0x1   :  { %11 = vsyncpa [#allocation7], 0 }
   0x2   :  { %12 = vsyncpa [#allocation10], 0 }
   0x3   :  { %13 = vsyncpa [#allocation5], 0  ;;  %s554_s18 = smov [#allocation6]  }
   0x4   :  { %s29_s19 = sshll.u32 %s554_s18, 4  ;;  %s30_s19 = int_to_ptr.vmem [resolvable:$true] %s29_s19 }
   0x5   :  { %s454_s20 = scalar_lea.vmem %s30_s19, 1024  ;;  %p459_p1 = scmp.lt.s32.totalorder %s30_s19, %s30_s19 }
   0x6   :  { %p455_p0 = scmp.ne.s32.totalorder %s30_s19, %s454_s20  ;;  %p460_p2 = scmp.lt.s32.totalorder %s454_s20, %s454_s20 }
   0x8   :  { %p461_p3 = por %p460_p2, %p459_p1 }
   0xa   :  { %p462_p4 = pnand %p461_p3, %p455_p0 }
   0xc   :  { %465 = shalt.err (!%p462_p4)
}
   0xd   :  { %s555_s21 = smov 64   ;;  %s556_s22 = smov 4  }
   0xe   :  { %35 = dma.hbm_to_vmem [thread:$0]  %s630_s1, 1024, %s30_s19, [#allocation7], %s555_s21, %s555_s21, %s556_s22  }
   0xf   :  { %s557_s25 = smov [#allocation3]   ;;  %s558_s27 = smov [#allocation8]  }
  0x10   :  { %s20_s26 = sshll.u32 %s557_s25, 4  ;;  %s41_s28 = sshll.u32 %s558_s27, 4  ;;  %s21_s26 = int_to_ptr.vmem [resolvable:$true] %s20_s26  ;;  %s42_s28 = int_to_ptr.vmem [resolvable:$true] %s41_s28 }
  0x11   :  { %s474_s29 = scalar_lea.vmem %s21_s26, 64  ;;  %p479_p6 = scmp.lt.s32.totalorder %s21_s26, %s21_s26 }
  0x12   :  { %p475_p5 = scmp.ne.s32.totalorder %s21_s26, %s474_s29  ;;  %p480_p7 = scmp.lt.s32.totalorder %s474_s29, %s474_s29 }
  0x14   :  { %p481_p8 = por %p480_p7, %p479_p6 }
  0x16   :  { %p482_p9 = pnand %p481_p8, %p475_p5 }
  0x18   :  { %485 = shalt.err (!%p482_p9)
}
  0x19   :  { %23 = dma.hbm_to_vmem [thread:$0]  %s629_s0, 64, %s21_s26, [#allocation4]  }
  0x1a   :  { %s494_s7 = scalar_lea.vmem %s42_s28, 1024  ;;  %p499_p11 = scmp.lt.s32.totalorder %s42_s28, %s42_s28 }
  0x1b   :  { %p495_p10 = scmp.ne.s32.totalorder %s42_s28, %s494_s7  ;;  %p500_p12 = scmp.lt.s32.totalorder %s494_s7, %s494_s7 }
  0x1d   :  { %p501_p13 = por %p500_p12, %p499_p11 }
  0x1f   :  { %p502_p0 = pnand %p501_p13, %p495_p10 }
  0x21   :  { %505 = shalt.err (!%p502_p0)
}
  0x22   :  { %47 = dma.hbm_to_vmem [thread:$0]  %s631_s2, 1024, %s42_s28, [#allocation7], %s555_s21, %s555_s21, %s556_s22  }
  0x23   :  { %s559_s9 = smov [#allocation9]  }
  0x24   :  { %s53_s10 = sshll.u32 %s559_s9, 4  ;;  %s54_s10 = int_to_ptr.vmem [resolvable:$true] %s53_s10 }
  0x25   :  { %s514_s11 = scalar_lea.vmem %s54_s10, 1024  ;;  %p519_p2 = scmp.lt.s32.totalorder %s54_s10, %s54_s10 }
  0x26   :  { %p515_p1 = scmp.ne.s32.totalorder %s54_s10, %s514_s11  ;;  %p520_p3 = scmp.lt.s32.totalorder %s514_s11, %s514_s11 }
  0x28   :  { %p521_p4 = por %p520_p3, %p519_p2 }
  0x2a   :  { %p522_p5 = pnand %p521_p4, %p515_p1 }
  0x2c   :  { %525 = shalt.err (!%p522_p5)
}
  0x2d   :  { %59 = dma.hbm_to_vmem [thread:$0]  %s632_s3, 1024, %s54_s10, [#allocation10], %s555_s21, %s555_s21, %s556_s22  }
  0x2e   :  { %546 = dma.done.wait [#allocation4], 64  }
  0x2f   :  { %547 = vsyncadd [#allocation4], 4294967232 }
  0x30   :  { %548 = dma.done.wait [#allocation7], 2048  }
  0x31   :  { %549 = vsyncadd [#allocation7], 4294965248 }
  0x32   :  { %550 = dma.done.wait [#allocation10], 1024  }
  0x33   :  { %551 = vsyncadd [#allocation10], 4294966272  ;;  %v560_v0 = vmov 0.0   ;;  %vm561_vm0 = vmmov 0   ;;  %v393_v1 = vld [vmem:[#allocation6 + $0x38] sm:$0xff]   ;;  %v399_v6 = vld [vmem:[#allocation8 + $0x30] sm:$0xff]  }
  0x34   :  { %417 = vmatprep.subr.bf16.mxu0 %v560_v0  ;;  %433 = vmatprep.mubr.msk.bf16.mxu0 %vm561_vm0, %v560_v0  ;;  %v400_v2 = vld [vmem:[#allocation8 + $0x38] sm:$0xff]   ;;  %v406_v7 = vld [vmem:[#allocation9 + $0x30] sm:$0xff]   ;;  %v321_v8 = vunpack.c.l.bf16 %v393_v1  ;;  %v322_v9 = vunpack.c.h.bf16 %v393_v1  ;;  %v349_v13 = vunpack.c.l.bf16 %v399_v6  ;;  %v350_v14 = vunpack.c.h.bf16 %v399_v6  ;;  %v398_v25 = vld [vmem:[#allocation8 + $0x28] sm:$0xff]   ;;  %s562_s13 = smov [#allocation11]  }
  0x35   :  { %v407_v3 = vld [vmem:[#allocation9 + $0x38] sm:$0xff]   ;;  %v353_v4 = vunpack.c.l.bf16 %v400_v2  ;;  %v354_v5 = vunpack.c.h.bf16 %v400_v2  ;;  %v392_v12 = vld [vmem:[#allocation6 + $0x30] sm:$0xff]   ;;  %v381_v15 = vunpack.c.l.bf16 %v406_v7  ;;  %v382_v16 = vunpack.c.h.bf16 %v406_v7  ;;  %v405_v26 = vld [vmem:[#allocation9 + $0x28] sm:$0xff]   ;;  %s279_s14 = sshll.u32 %s562_s13, 4  ;;  %s280_s14 = int_to_ptr.vmem [resolvable:$true] %s279_s14 }
  0x36   :  { %v385_v10 = vunpack.c.l.bf16 %v407_v3  ;;  %v386_v11 = vunpack.c.h.bf16 %v407_v3  ;;  %v317_v19 = vunpack.c.l.bf16 %v392_v12  ;;  %v318_v20 = vunpack.c.h.bf16 %v392_v12  ;;  %v391_v32 = vld [vmem:[#allocation6 + $0x28] sm:$0xff]   ;;  %v397_v40 = vld [vmem:[#allocation8 + $0x20] sm:$0xff]   ;;  %v396_v54 = vld [vmem:[#allocation8 + $0x18] sm:$0xff]   ;;  %s526_s15 = scalar_lea.vmem %s280_s14, 128  ;;  %p531_p7 = scmp.lt.s32.totalorder %s280_s14, %s280_s14 }
  0x37   :  { %v188_v23 = vmul.f32 %v381_v15, %v349_v13  ;;  %v189_v24 = vmul.f32 %v382_v16, %v350_v14  ;;  %v345_v28 = vunpack.c.l.bf16 %v398_v25  ;;  %v346_v29 = vunpack.c.h.bf16 %v398_v25  ;;  %v404_v41 = vld [vmem:[#allocation9 + $0x20] sm:$0xff]   ;;  %v403_v55 = vld [vmem:[#allocation9 + $0x18] sm:$0xff]   ;;  %v402_v6 = vld [vmem:[#allocation9 + $0x10] sm:$0xff]   ;;  %p527_p6 = scmp.ne.s32.totalorder %s280_s14, %s526_s15  ;;  %p532_p8 = scmp.lt.s32.totalorder %s526_s15, %s526_s15 }
  0x38   :  { %v190_v17 = vmul.f32 %v385_v10, %v353_v4  ;;  %v191_v18 = vmul.f32 %v386_v11, %v354_v5  ;;  %v377_v33 = vunpack.c.l.bf16 %v405_v26  ;;  %v378_v34 = vunpack.c.h.bf16 %v405_v26  ;;  %v390_v46 = vld [vmem:[#allocation6 + $0x20] sm:$0xff]   ;;  %v389_v60 = vld [vmem:[#allocation6 + $0x18] sm:$0xff]   ;;  %v395_v5 = vld [vmem:[#allocation8 + $0x10] sm:$0xff]  }
  0x39   :  { %v204_v30 = vadd.f32 %v317_v19, %v188_v23  ;;  %v205_v31 = vadd.f32 %v318_v20, %v189_v24  ;;  %v313_v35 = vunpack.c.l.bf16 %v391_v32  ;;  %v314_v37 = vunpack.c.h.bf16 %v391_v32  ;;  %v388_v11 = vld [vmem:[#allocation6 + $0x10] sm:$0xff]   ;;  %v394_v19 = vld [vmem:[#allocation8 + $0x8] sm:$0xff]   ;;  %p533_p9 = por %p532_p8, %p531_p7 }
  0x3a   :  { %v206_v21 = vadd.f32 %v321_v8, %v190_v17  ;;  %v207_v22 = vadd.f32 %v322_v9, %v191_v18  ;;  %v186_v38 = vmul.f32 %v377_v33, %v345_v28  ;;  %v187_v39 = vmul.f32 %v378_v34, %v346_v29  ;;  %v401_v20 = vld [vmem:[#allocation9 + $0x8] sm:$0xff]   ;;  %v324_v33 = vld [vmem:[#allocation8] sm:$0xff]  }
  0x3b   :  { %v216_v36 = vpack.c.bf16 %v205_v31, %v204_v30  ;;  %v341_v42 = vunpack.c.l.bf16 %v397_v40  ;;  %v342_v43 = vunpack.c.h.bf16 %v397_v40  ;;  %v373_v47 = vunpack.c.l.bf16 %v404_v41  ;;  %v387_v25 = vld [vmem:[#allocation6 + $0x8] sm:$0xff]   ;;  %v356_v34 = vld [vmem:[#allocation9] sm:$0xff]   ;;  %p534_p10 = pnand %p533_p9, %p527_p6 }
  0x3c   :  { %v217_v27 = vpack.c.bf16 %v207_v22, %v206_v21  ;;  %v202_v44 = vadd.f32 %v313_v35, %v186_v38  ;;  %v203_v45 = vadd.f32 %v314_v37, %v187_v39  ;;  %v374_v48 = vunpack.c.h.bf16 %v404_v41  ;;  %v292_v39 = vld [vmem:[#allocation6] sm:$0xff]  }
  0x3d   :  { %v309_v49 = vunpack.c.l.bf16 %v390_v46  ;;  %v310_v51 = vunpack.c.h.bf16 %v390_v46  ;;  %v184_v52 = vmul.f32 %v373_v47, %v341_v42  ;;  %v337_v56 = vunpack.c.l.bf16 %v396_v54 }
  0x3e   :  { %418 = vmatpush3.bf16.xpose.msra.mxu0 %v217_v27  ;;  %v215_v50 = vpack.c.bf16 %v203_v45, %v202_v44  ;;  %v185_v53 = vmul.f32 %v374_v48, %v342_v43  ;;  %v338_v57 = vunpack.c.h.bf16 %v396_v54  ;;  %v369_v61 = vunpack.c.l.bf16 %v403_v55 }
  0x3f   :  { %419 = vmatprep.subr.bf16.mxu0 %v560_v0  ;;  %v200_v58 = vadd.f32 %v309_v49, %v184_v52  ;;  %v370_v62 = vunpack.c.h.bf16 %v403_v55  ;;  %v305_v63 = vunpack.c.l.bf16 %v389_v60  ;;  %v306_v2 = vunpack.c.h.bf16 %v389_v60 }
  0x40   :  { %v201_v59 = vadd.f32 %v310_v51, %v185_v53  ;;  %v182_v3 = vmul.f32 %v369_v61, %v337_v56  ;;  %v333_v7 = vunpack.c.l.bf16 %v395_v5  ;;  %v334_v8 = vunpack.c.h.bf16 %v395_v5  ;;  %v290_v51 = vld [vmem:[%s633_s4] ss:$0 sm:$0xff] }
  0x41   :  { %v183_v4 = vmul.f32 %v370_v62, %v338_v57  ;;  %v365_v12 = vunpack.c.l.bf16 %v402_v6  ;;  %v366_v13 = vunpack.c.h.bf16 %v402_v6  ;;  %v301_v14 = vunpack.c.l.bf16 %v388_v11 }
  0x42   :  { %v214_v1 = vpack.c.bf16 %v201_v59, %v200_v58  ;;  %v198_v9 = vadd.f32 %v305_v63, %v182_v3  ;;  %v302_v16 = vunpack.c.h.bf16 %v388_v11  ;;  %v329_v21 = vunpack.c.l.bf16 %v394_v19 }
  0x43   :  { %v199_v10 = vadd.f32 %v306_v2, %v183_v4  ;;  %v180_v17 = vmul.f32 %v365_v12, %v333_v7  ;;  %v181_v18 = vmul.f32 %v366_v13, %v334_v8  ;;  %v330_v22 = vunpack.c.h.bf16 %v394_v19 }
  0x44   :  { %v361_v26 = vunpack.c.l.bf16 %v401_v20  ;;  %v362_v27 = vunpack.c.h.bf16 %v401_v20  ;;  %v297_v28 = vunpack.c.l.bf16 %v387_v25  ;;  %v298_v30 = vunpack.c.h.bf16 %v387_v25 }
  0x45   :  { %v213_v15 = vpack.c.bf16 %v199_v10, %v198_v9  ;;  %v196_v23 = vadd.f32 %v301_v14, %v180_v17  ;;  %v197_v24 = vadd.f32 %v302_v16, %v181_v18  ;;  %v325_v35 = vunpack.c.l.bf16 %v324_v33 }
  0x46   :  { %420 = vmatpush3.bf16.xpose.msra.mxu0 %v216_v36  ;;  %v178_v31 = vmul.f32 %v361_v26, %v329_v21  ;;  %v179_v32 = vmul.f32 %v362_v27, %v330_v22  ;;  %v326_v36 = vunpack.c.h.bf16 %v324_v33  ;;  %v357_v40 = vunpack.c.l.bf16 %v356_v34 }
  0x47   :  { %421 = vmatprep.subr.bf16.mxu0 %v560_v0  ;;  %v212_v29 = vpack.c.bf16 %v197_v24, %v196_v23  ;;  %v358_v41 = vunpack.c.h.bf16 %v356_v34  ;;  %v293_v42 = vunpack.c.l.bf16 %v292_v39  ;;  %v294_v44 = vunpack.c.h.bf16 %v292_v39 }
  0x48   :  { %v194_v37 = vadd.f32 %v297_v28, %v178_v31  ;;  %v195_v38 = vadd.f32 %v298_v30, %v179_v32  ;;  %v176_v45 = vmul.f32 %v357_v40, %v325_v35 }
  0x49   :  { %v177_v46 = vmul.f32 %v358_v41, %v326_v36 }
  0x4a   :  { %v211_v43 = vpack.c.bf16 %v195_v38, %v194_v37  ;;  %v192_v47 = vadd.f32 %v293_v42, %v176_v45 }
  0x4b   :  { %v193_v48 = vadd.f32 %v294_v44, %v177_v46 }
  0x4d   :  { %v210_v49 = vpack.c.bf16 %v193_v48, %v192_v47 }
  0x4e   :  { %422 = vmatpush3.bf16.xpose.msra.mxu0 %v215_v50  ;;  %v209_v50 = vld [vmem:[#allocation3] sm:$0xf] }
  0x4f   :  { %423 = vmatprep.subr.bf16.mxu0 %v560_v0 }
  0x56   :  { %424 = vmatpush3.bf16.xpose.msra.mxu0 %v214_v1 }
  0x57   :  { %425 = vmatprep.subr.bf16.mxu0 %v560_v0 }
  0x5e   :  { %426 = vmatpush3.bf16.xpose.msra.mxu0 %v213_v15 }
  0x5f   :  { %427 = vmatprep.subr.bf16.mxu0 %v560_v0 }
  0x66   :  { %428 = vmatpush3.bf16.xpose.msra.mxu0 %v212_v29 }
  0x67   :  { %429 = vmatprep.subr.bf16.mxu0 %v560_v0 }
  0x6e   :  { %430 = vmatpush3.bf16.xpose.msra.mxu0 %v211_v43 }
  0x6f   :  { %431 = vmatprep.subr.bf16.mxu0 %v560_v0 }
  0x76   :  { %432 = vmatpush3.bf16.xpose.msra.mxu0 %v210_v49 }
  0x7d   :  { %434 = vmatmul.mubr.bf16.vlgmr.msra.gmra.mxu0 %v209_v50 }
 0x13d   :  { %v252_v52 = vpop.f32.mrf.mxu0 }
 0x13e   :  { %v271_v53 = vadd.f32 %v290_v51, %v252_v52 }
 0x13f   :  { %v435_v54 = vpop.f32.mrf.mxu0 }
 0x140   :  { %272 = vst [vmem:[#allocation11] sm:$0xff] %v271_v53 }
 0x141   :  { %v255_v55 = vpop.f32.mrf.mxu0 }
 0x142   :  { %537 = shalt.err (!%p534_p10)
}
 0x143   :  { %282 = dma.vmem_to_hbm [thread:$0]  %s280_s14, 128, %s634_s5, [#allocation5]   ;;  %v436_v0 = vpop.f32.mrf.mxu0 }
 0x144   :  { %552 = dma.done.wait [#allocation5], 128  }
 0x145   :  { %553 = vsyncadd [#allocation5], 4294967168 }
 0x146   :  { %286 = vsyncpa [#allocation4], 1 }
 0x147   :  { %287 = vsyncpa [#allocation7], 1 }
 0x148   :  { %288 = vsyncpa [#allocation10], 1 }
 0x149   :  { %289 = vsyncpa [#allocation5], 1 }

</bundles_post_ra>
